<compile_context>
chip_gen: v6e
topology: v6e:2x2x1
jax: 0.10.0
libtpu: 0.0.40
codegen_flags: <defaults>
</compile_context>

<pallas_src>
import functools

import jax
import jax.numpy as jnp
from jax.experimental import pallas as pl
from jax.experimental.pallas import tpu as pltpu


def _round_up(x, m):
    return (x + m - 1) // m * m


def _mlp_kernel(xt_ref, w1_ref, b1_ref, w2_ref, b2_ref, w3_ref, b3_ref, o_ref):
    # fc1: (64, D) @ (D, block_b) on the MXU, bf16 operands, f32 accumulate.
    h1 = jnp.dot(w1_ref[...], xt_ref[...], preferred_element_type=jnp.float32)
    h1 = jnp.maximum(h1 + b1_ref[...], 0.0)            # bias + ReLU in f32
    # dropout (inference) == identity.
    # fc2: (32, 64) @ (64, block_b).
    h2 = jnp.dot(w2_ref[...], h1.astype(jnp.bfloat16),
                 preferred_element_type=jnp.float32)
    h2 = jnp.maximum(h2 + b2_ref[...], 0.0)
    # fc3 (out_features == 1): VPU multiply + cross-sublane reduce instead of
    # an N=1 MXU matmul; result is already lane-major -> lane-dense store.
    out = jnp.sum(h2 * w3_ref[...], axis=0, keepdims=True) + b3_ref[...]
    o_ref[...] = out[None].astype(o_ref.dtype)          # (1, 1, block_b)


@functools.partial(jax.jit, static_argnames=("block_b",))
def neural_forward(x, params, *, block_b=None):
    """x: (B, input_size) f32; params in PyTorch-native layouts (see init)."""
    B, D = x.shape
    w1, b1 = params["w1"], params["b1"]   # (64, D), (64, 1)
    w2, b2 = params["w2"], params["b2"]   # (32, 64), (32, 1)
    w3, b3 = params["w3"], params["b3"]   # (32, 1), (1, 1)

    if block_b is None:
        # 512-row tiles (512-1024 rows ~85% of HBM roofline), capped so the
        # double-buffered bf16 x^T tile stays well under the scoped-VMEM
        # default (32 MiB on v6e/v7x): 2 buffers * block_b * D * 2 B <= ~16 MiB.
        vmem_cap = max(128, ((8 * 1024 * 1024) // max(D * 2, 1)) // 128 * 128)
        block_b = min(512, _round_up(B, 128), vmem_cap)
    assert block_b % 128 == 0, "block_b must be a multiple of 128 lanes"

    B_pad = _round_up(B, block_b)
    num_blocks = B_pad // block_b

    # Feature-major, lane-dense bf16 view of x (pad rows are zero; their
    # outputs are discarded below).
    xt = x.astype(jnp.bfloat16).T                       # (D, B)
    if B_pad != B:
        xt = jnp.pad(xt, ((0, 0), (0, B_pad - B)))      # (D, B_pad)

    w1b = w1.astype(jnp.bfloat16)
    w2b = w2.astype(jnp.bfloat16)

    flops = 2 * B_pad * (64 * D + 32 * 64 + 32)
    bytes_accessed = (
        B_pad * D * 2             # x^T (bf16) read
        + B_pad * 4               # output write
        + (64 * D + 32 * 64) * 2  # bf16 weights
        + (64 + 32 + 32 + 1) * 4  # biases + w3
    )

    out = pl.pallas_call(
        _mlp_kernel,
        out_shape=jax.ShapeDtypeStruct((num_blocks, 1, block_b), x.dtype),
        grid_spec=pltpu.PrefetchScalarGridSpec(
            num_scalar_prefetch=0,
            grid=(num_blocks,),
            in_specs=[
                pl.BlockSpec((D, block_b), lambda i: (0, i)),   # x^T tile
                pl.BlockSpec(w1b.shape, lambda i: (0, 0)),
                pl.BlockSpec(b1.shape, lambda i: (0, 0)),
                pl.BlockSpec(w2b.shape, lambda i: (0, 0)),
                pl.BlockSpec(b2.shape, lambda i: (0, 0)),
                pl.BlockSpec(w3.shape, lambda i: (0, 0)),
                pl.BlockSpec(b3.shape, lambda i: (0, 0)),
            ],
            out_specs=pl.BlockSpec((1, 1, block_b), lambda i: (i, 0, 0)),
        ),
        compiler_params=pltpu.CompilerParams(
            dimension_semantics=("parallel",),   # megacore sharding on v7x
        ),
        cost_estimate=pl.CostEstimate(
            flops=int(flops), transcendentals=0,
            bytes_accessed=int(bytes_accessed)),
    )(xt, w1b, b1, w2b, b2, w3, b3)

    # (num_blocks, 1, block_b) -> (B_pad, 1) -> drop pad rows.
    return out.reshape(B_pad, 1)[:B]


def init_params(key, input_size):
    """PyTorch nn.Linear default init, stored in the layouts the kernel wants:
    w1:(64,D) b1:(64,1) w2:(32,64) b2:(32,1) w3:(32,1)=fc3.weight.T b3:(1,1)."""
    def linear(k, fan_in, fan_out):
        kw, kb = jax.random.split(k)
        bound = 1.0 / jnp.sqrt(fan_in)
        w = jax.random.uniform(kw, (fan_out, fan_in), jnp.float32, -bound, bound)
        b = jax.random.uniform(kb, (fan_out, 1), jnp.float32, -bound, bound)
        return w, b

    k1, k2, k3 = jax.random.split(key, 3)
    w1, b1 = linear(k1, input_size, 64)
    w2, b2 = linear(k2, 64, 32)
    w3, b3 = linear(k3, 32, 1)
    return {"w1": w1, "b1": b1, "w2": w2, "b2": b2,
            "w3": w3.T, "b3": b3}       # w3 stored as (32, 1)


def neural_ref(x, params):
    """Pure-JAX f32 reference (eval-mode dropout)."""
    h1 = jnp.maximum(x @ params["w1"].T + params["b1"].T, 0.0)
    h2 = jnp.maximum(h1 @ params["w2"].T + params["b2"].T, 0.0)
    return h2 @ params["w3"] + params["b3"]


if __name__ == "__main__":
    key = jax.random.PRNGKey(0)
    k_param, k_x = jax.random.split(key)

    batch = 8
    input_size = 32

    params = init_params(k_param, input_size)
    x = jax.random.normal(k_x, (batch, input_size), jnp.float32)

    out = neural_forward(x, params)
    out = jax.block_until_ready(out)

    ref = neural_ref(x, params)
    assert out.shape == (batch, 1), out.shape
    # bf16 MXU operands with f32 accumulation: ~1e-2 relative agreement.
    assert jnp.allclose(out, ref, atol=2e-2, rtol=2e-2), "mismatch vs reference"

    print("KERNEL_OK")
</pallas_src>

<mosaic_0001>
module attributes {stable_mosaic.version = 11 : i64} {
  func.func @_mlp_kernel(%arg0: i32, %arg1: memref<32x128xbf16, #tpu.memory_space<vmem>>, %arg2: memref<64x32xbf16, #tpu.memory_space<vmem>>, %arg3: memref<64x1xf32, #tpu.memory_space<vmem>>, %arg4: memref<32x64xbf16, #tpu.memory_space<vmem>>, %arg5: memref<32x1xf32, #tpu.memory_space<vmem>>, %arg6: memref<32x1xf32, #tpu.memory_space<vmem>>, %arg7: memref<1x1xf32, #tpu.memory_space<vmem>>, %arg8: memref<1x1x128xf32, #tpu.memory_space<vmem>>) attributes {dimension_semantics = [#tpu.dimension_semantics<parallel>], iteration_bounds = array<i64: 1>, scalar_prefetch = 0 : i64, scratch_operands = 0 : i64, tpu.core_type = #tpu.core_type<tc>, window_params = [{transform_indices = @transform_0, window_bounds = array<i64: 32, 128>}, {pipeline_mode = #tpu.pipeline_mode<synchronous>, transform_indices = @transform_1, window_bounds = array<i64: 64, 32>}, {pipeline_mode = #tpu.pipeline_mode<synchronous>, transform_indices = @transform_2, window_bounds = array<i64: 64, 1>}, {pipeline_mode = #tpu.pipeline_mode<synchronous>, transform_indices = @transform_3, window_bounds = array<i64: 32, 64>}, {pipeline_mode = #tpu.pipeline_mode<synchronous>, transform_indices = @transform_4, window_bounds = array<i64: 32, 1>}, {pipeline_mode = #tpu.pipeline_mode<synchronous>, transform_indices = @transform_5, window_bounds = array<i64: 32, 1>}, {pipeline_mode = #tpu.pipeline_mode<synchronous>, transform_indices = @transform_6, window_bounds = array<i64: 1, 1>}, {transform_indices = @transform_7, window_bounds = array<i64: 1, 1, 128>}]} {
    %c0 = arith.constant 0 : index
    %c0_0 = arith.constant 0 : index
    %0 = vector.load %arg2[%c0, %c0_0] : memref<64x32xbf16, #tpu.memory_space<vmem>>, vector<64x32xbf16>
    %c0_1 = arith.constant 0 : index
    %c0_2 = arith.constant 0 : index
    %1 = vector.load %arg1[%c0_1, %c0_2] : memref<32x128xbf16, #tpu.memory_space<vmem>>, vector<32x128xbf16>
    %cst = arith.constant dense<0.000000e+00> : vector<64x128xf32>
    %2 = tpu.matmul %0, %1, %cst {dimension_numbers = #tpu.dot_dimension_numbers<[1], [0], [0], [1], [0, 0, 1, 1], [], []>} : vector<64x32xbf16>, vector<32x128xbf16>, vector<64x128xf32> -> vector<64x128xf32>
    %c0_3 = arith.constant 0 : index
    %c0_4 = arith.constant 0 : index
    %3 = vector.load %arg3[%c0_3, %c0_4] : memref<64x1xf32, #tpu.memory_space<vmem>>, vector<64x1xf32>
    %4 = vector.broadcast %3 : vector<64x1xf32> to vector<64x128xf32>
    %5 = arith.addf %2, %4 : vector<64x128xf32>
    %cst_5 = arith.constant 0.000000e+00 : f32
    %6 = vector.broadcast %cst_5 : f32 to vector<64x128xf32>
    %7 = arith.maximumf %5, %6 : vector<64x128xf32>
    %c0_6 = arith.constant 0 : index
    %c0_7 = arith.constant 0 : index
    %8 = vector.load %arg4[%c0_6, %c0_7] : memref<32x64xbf16, #tpu.memory_space<vmem>>, vector<32x64xbf16>
    %9 = arith.truncf %7 : vector<64x128xf32> to vector<64x128xbf16>
    %cst_8 = arith.constant dense<0.000000e+00> : vector<32x128xf32>
    %10 = tpu.matmul %8, %9, %cst_8 {dimension_numbers = #tpu.dot_dimension_numbers<[1], [0], [0], [1], [0, 0, 1, 1], [], []>} : vector<32x64xbf16>, vector<64x128xbf16>, vector<32x128xf32> -> vector<32x128xf32>
    %c0_9 = arith.constant 0 : index
    %c0_10 = arith.constant 0 : index
    %11 = vector.load %arg5[%c0_9, %c0_10] : memref<32x1xf32, #tpu.memory_space<vmem>>, vector<32x1xf32>
    %12 = vector.broadcast %11 : vector<32x1xf32> to vector<32x128xf32>
    %13 = arith.addf %10, %12 : vector<32x128xf32>
    %cst_11 = arith.constant 0.000000e+00 : f32
    %14 = vector.broadcast %cst_11 : f32 to vector<32x128xf32>
    %15 = arith.maximumf %13, %14 : vector<32x128xf32>
    %c0_12 = arith.constant 0 : index
    %c0_13 = arith.constant 0 : index
    %16 = vector.load %arg6[%c0_12, %c0_13] : memref<32x1xf32, #tpu.memory_space<vmem>>, vector<32x1xf32>
    %17 = vector.broadcast %16 : vector<32x1xf32> to vector<32x128xf32>
    %18 = arith.mulf %15, %17 : vector<32x128xf32>
    %cst_14 = arith.constant dense<0.000000e+00> : vector<128xf32>
    %19 = vector.multi_reduction <add>, %18, %cst_14 [0] : vector<32x128xf32> to vector<128xf32>
    %20 = vector.shape_cast %19 : vector<128xf32> to vector<1x128xf32>
    %c0_15 = arith.constant 0 : index
    %c0_16 = arith.constant 0 : index
    %21 = vector.load %arg7[%c0_15, %c0_16] : memref<1x1xf32, #tpu.memory_space<vmem>>, vector<1x1xf32>
    %22 = vector.broadcast %21 : vector<1x1xf32> to vector<1x128xf32>
    %23 = arith.addf %20, %22 : vector<1x128xf32>
    %24 = vector.shape_cast %23 : vector<1x128xf32> to vector<1x1x128xf32>
    %c0_17 = arith.constant 0 : index
    %c0_18 = arith.constant 0 : index
    %c0_19 = arith.constant 0 : index
    %25 = vector.load %arg8[%c0_17, %c0_18, %c0_19] : memref<1x1x128xf32, #tpu.memory_space<vmem>>, vector<1x1x128xf32>
    tpu.vector_store %arg8[%c0_17, %c0_18, %c0_19], %24 {strides = array<i32>} : memref<1x1x128xf32, #tpu.memory_space<vmem>>, vector<1x1x128xf32>,
    return
  }
  func.func @transform_0(%arg0: i32) -> (i32, i32) {
    %c0_i32 = arith.constant 0 : i32
    %c0_i32_0 = arith.constant 0 : i32
    return %c0_i32, %arg0 : i32, i32
  }
  func.func @transform_1(%arg0: i32) -> (i32, i32) {
    %c0_i32 = arith.constant 0 : i32
    %c0_i32_0 = arith.constant 0 : i32
    %c0_i32_1 = arith.constant 0 : i32
    return %c0_i32, %c0_i32_0 : i32, i32
  }
  func.func @transform_2(%arg0: i32) -> (i32, i32) {
    %c0_i32 = arith.constant 0 : i32
    %c0_i32_0 = arith.constant 0 : i32
    %c0_i32_1 = arith.constant 0 : i32
    return %c0_i32, %c0_i32_0 : i32, i32
  }
  func.func @transform_3(%arg0: i32) -> (i32, i32) {
    %c0_i32 = arith.constant 0 : i32
    %c0_i32_0 = arith.constant 0 : i32
    %c0_i32_1 = arith.constant 0 : i32
    return %c0_i32, %c0_i32_0 : i32, i32
  }
  func.func @transform_4(%arg0: i32) -> (i32, i32) {
    %c0_i32 = arith.constant 0 : i32
    %c0_i32_0 = arith.constant 0 : i32
    %c0_i32_1 = arith.constant 0 : i32
    return %c0_i32, %c0_i32_0 : i32, i32
  }
  func.func @transform_5(%arg0: i32) -> (i32, i32) {
    %c0_i32 = arith.constant 0 : i32
    %c0_i32_0 = arith.constant 0 : i32
    %c0_i32_1 = arith.constant 0 : i32
    return %c0_i32, %c0_i32_0 : i32, i32
  }
  func.func @transform_6(%arg0: i32) -> (i32, i32) {
    %c0_i32 = arith.constant 0 : i32
    %c0_i32_0 = arith.constant 0 : i32
    %c0_i32_1 = arith.constant 0 : i32
    return %c0_i32, %c0_i32_0 : i32, i32
  }
  func.func @transform_7(%arg0: i32) -> (i32, i32, i32) {
    %c0_i32 = arith.constant 0 : i32
    %c0_i32_0 = arith.constant 0 : i32
    %c0_i32_1 = arith.constant 0 : i32
    return %arg0, %c0_i32, %c0_i32_0 : i32, i32, i32
  }
}

</mosaic_0001>

<bundles_post_ra>
// kernel: neural_forward.1
= control target key start
LH: loop header
LB: loop body
LE: loop exit
PB: predicated region body
PF: predicated region fallthrough
CT: control target
= control target key end

     0   :  { %v423_v1 = vmov 0   ;;  %vm121_vm0 = vcmask 261120   ;;  %vm249_vm1 = vcmask 523264   ;;  %s548_s0 = inlined_call_operand.vmem [shape: bf16[32,128], index: 0, kind: input, shape index: {}]   ;;  %s549_s1 = inlined_call_operand.vmem [shape: bf16[64,32], index: 1, kind: input, shape index: {}]   ;;  %s550_s6 = inlined_call_operand.<no memory space> [shape: f32[1,1], index: 6, kind: input, shape index: {}]   ;;  %s551_s2 = inlined_call_operand.vmem [shape: f32[64,1], index: 2, kind: input, shape index: {}]   ;;  %s552_s4 = inlined_call_operand.vmem [shape: f32[32,1], index: 4, kind: input, shape index: {}]   ;;  %s553_s5 = inlined_call_operand.vmem [shape: f32[32,1], index: 5, kind: input, shape index: {}]   ;;  %s554_s3 = inlined_call_operand.vmem [shape: bf16[32,64], index: 3, kind: input, shape index: {}]   ;;  %s555_s7 = inlined_call_operand.vmem [shape: f32[1,1,128], index: 7, kind: output, shape index: {}]  }
   0x1   :  { %v415_v0 = vld [vmem:[%s548_s0 + $0x8] sm:$0xff]   ;;  %413 = vset.pattern.permute.xlu0 %v423_v1  ;;  %414 = vset.pattern.permute.xlu1 %v423_v1  ;;  %v12_v2 = vstv %s550_s6  ;;  %v416_v3 = vld [vmem:[%s548_s0] sm:$0xff]   ;;  %v47_v6 = vld [vmem:[%s551_s2 + $0x30] sm:$0xff] }
   0x2   :  { %13 = vst [vmem:[#allocation2] sm:$0x1] %v12_v2  ;;  %388 = vmatprep.subr.bf16.mxu0 %v415_v0  ;;  %v417_v4 = vld [vmem:[%s549_s1] sm:$0xff]   ;;  %v418_v5 = vld [vmem:[%s549_s1 + $0x8] sm:$0xff]   ;;  %v419_v8 = vld [vmem:[%s549_s1 + $0x10] sm:$0xff]   ;;  %81 = vperm.xlu0 %413, %v47_v6  }
   0x3   :  { %389 = vmatpush3.bf16.msra.mxu0 %v415_v0  ;;  %392 = vmatprep.mubr.msk.bf16.mxu0 %vm121_vm0, %v417_v4  ;;  %v45_v7 = vld [vmem:[%s551_s2 + $0x20] sm:$0xff]  ;;  %v48_v9 = vld [vmem:[%s551_s2 + $0x38] sm:$0xff]  ;;  %v46_v10 = vld [vmem:[%s551_s2 + $0x28] sm:$0xff] }
   0x4   :  { %390 = vmatprep.subr.bf16.mxu0 %v416_v3  ;;  %71 = vperm.xlu1 %414, %v45_v7   ;;  %v43_v11 = vld [vmem:[%s551_s2 + $0x10] sm:$0xff]  ;;  %v44_v12 = vld [vmem:[%s551_s2 + $0x18] sm:$0xff]  ;;  %v41_v14 = vld [vmem:[%s551_s2] sm:$0xff] }
   0x5   :  { %v420_v13 = vld [vmem:[%s549_s1 + $0x18] sm:$0xff]   ;;  %v42_v15 = vld [vmem:[%s551_s2 + $0x8] sm:$0xff]  ;;  %v215_v16 = vld [vmem:[%s552_s4] sm:$0xff] }
   0x6   :  { %86 = vperm.xlu0 %413, %v48_v9   ;;  %v216_v17 = vld [vmem:[%s552_s4 + $0x8] sm:$0xff]  ;;  %v217_v18 = vld [vmem:[%s552_s4 + $0x10] sm:$0xff]  ;;  %v218_v19 = vld [vmem:[%s552_s4 + $0x18] sm:$0xff] }
   0x7   :  { %391 = vmatpush3.bf16.msra.mxu0 %v416_v3  ;;  %v309_v20 = vld [vmem:[%s553_s5] sm:$0xff]  ;;  %v310_v21 = vld [vmem:[%s553_s5 + $0x8] sm:$0xff]  ;;  %v311_v22 = vld [vmem:[%s553_s5 + $0x10] sm:$0xff] }
   0x8   :  { %76 = vperm.xlu1 %414, %v46_v10   ;;  %v312_v23 = vld [vmem:[%s553_s5 + $0x18] sm:$0xff]  ;;  %v421_v25 = vld [vmem:[%s554_s3] sm:$0xff]   ;;  %v422_v62 = vld [vmem:[%s554_s3 + $0x8] sm:$0xff]  }
   0x9   :  { %v346_v24 = vld [vmem:[#allocation2] sm:$0x1]  ;;  %408 = vmatprep.mubr.msk.bf16.mxu1 %vm249_vm1, %v421_v25  ;;  %v352_v25 = vlaneseq }
   0xa   :  { %393 = vmatmul.mubr.msk.bf16.vlgmr.msra.gmra.mxu0 %vm121_vm0, %v418_v5  ;;  %61 = vperm.xlu0 %413, %v43_v11  }
   0xb   :  { %396 = vmatprep.mubr.msk.bf16.mxu0 %vm121_vm0, %v419_v8 }
   0xc   :  { %66 = vperm.xlu1 %414, %v44_v12  }
   0xe   :  { %51 = vperm.xlu0 %413, %v41_v14  }
  0x10   :  { %56 = vperm.xlu1 %414, %v42_v15  }
  0x12   :  { %397 = vmatmul.mubr.msk.bf16.gmra.mxu0 %vm121_vm0, %v420_v13  ;;  %221 = vperm.xlu0 %413, %v215_v16  }
  0x14   :  { %226 = vperm.xlu1 %414, %v216_v17  }
  0x16   :  { %231 = vperm.xlu0 %413, %v217_v18  }
  0x18   :  { %236 = vperm.xlu1 %414, %v218_v19  }
  0x1a   :  { %315 = vperm.xlu0 %413, %v309_v20  }
  0x1c   :  { %320 = vperm.xlu1 %414, %v310_v21  }
  0x1e   :  { %325 = vperm.xlu0 %413, %v311_v22  }
  0x20   :  { %330 = vperm.xlu1 %414, %v312_v23  }
  0x22   :  { %349 = vperm.xlu0 %413, %v346_v24  }
  0x7d   :  { %v82_v28 = vpop.permute.xlu0 %81 }
  0x7f   :  { %v72_v26 = vpop.permute.xlu1 %71 }
  0x81   :  { %v87_v33 = vpop.permute.xlu0 %86 }
  0x83   :  { %v77_v31 = vpop.permute.xlu1 %76 }
  0x85   :  { %v62_v41 = vpop.permute.xlu0 %61 }
  0x87   :  { %v67_v37 = vpop.permute.xlu1 %66 }
  0x89   :  { %v52_v55 = vpop.permute.xlu0 %51 }
  0x8b   :  { %v57_v51 = vpop.permute.xlu1 %56 }
  0x8d   :  { %v222_v63 = vpop.permute.xlu0 %221 }
  0x8f   :  { %v227_v0 = vpop.permute.xlu1 %226 }
  0x91   :  { %v232_v1 = vpop.permute.xlu0 %231 }
  0x93   :  { %v237_v3 = vpop.permute.xlu1 %236 }
  0x95   :  { %v316_v8 = vpop.permute.xlu0 %315 }
  0x97   :  { %v321_v13 = vpop.permute.xlu1 %320 }
  0x99   :  { %v326_v19 = vpop.permute.xlu0 %325 }
  0x9b   :  { %v331_v22 = vpop.permute.xlu1 %330 }
  0xca   :  { %v394_v27 = vpop.f32.mrf.mxu0 }
  0xcb   :  { %v177_v47 = vadd.f32 %v394_v27, %v62_v41 }
  0xcc   :  { %v168_v29 = vpop.f32.mrf.mxu0 }
  0xcd   :  { %v201_v56 = vmax.f32 %v177_v47, 0.0  ;;  %v169_v57 = vadd.f32 %v168_v29, %v52_v55 }
  0xce   :  { %v395_v30 = vpop.f32.mrf.mxu0 }
  0xcf   :  { %v180_v43 = vadd.f32 %v395_v30, %v67_v37  ;;  %v199_v60 = vmax.f32 %v169_v57, 0.0 }
  0xd0   :  { %v171_v32 = vpop.f32.mrf.mxu0 }
  0xd1   :  { %v202_v52 = vmax.f32 %v180_v43, 0.0  ;;  %v172_v53 = vadd.f32 %v171_v32, %v57_v51 }
  0xd2   :  { %v398_v34 = vpop.f32.mrf.mxu0 }
  0xd3   :  { %v193_v36 = vadd.f32 %v398_v34, %v82_v28  ;;  %v212_v58 = vpack.c.bf16 %v202_v52, %v201_v56  ;;  %v200_v59 = vmax.f32 %v172_v53, 0.0  ;;  %v353_v28 = vshrl.u32 %v352_v25, 7 }
  0xd4   :  { %v184_v35 = vpop.f32.mrf.mxu0 }
  0xd5   :  { %v185_v39 = vadd.f32 %v184_v35, %v72_v26  ;;  %v205_v44 = vmax.f32 %v193_v36, 0.0  ;;  %v211_v61 = vpack.c.bf16 %v200_v59, %v199_v60 }
  0xd6   :  { %v399_v38 = vpop.f32.mrf.mxu0 }
  0xd7   :  { %v196_v40 = vadd.f32 %v399_v38, %v87_v33  ;;  %v203_v48 = vmax.f32 %v185_v39, 0.0  ;;  %v350_v33 = vpop.permute.xlu0 %349 }
  0xd8   :  { %v187_v42 = vpop.f32.mrf.mxu0 }
  0xd9   :  { %v206_v45 = vmax.f32 %v196_v40, 0.0  ;;  %v188_v46 = vadd.f32 %v187_v42, %v77_v31  ;;  %v354_v31 = vsub.s32 0, %v353_v28 }
  0xdb   :  { %v204_v49 = vmax.f32 %v188_v46, 0.0  ;;  %v214_v50 = vpack.c.bf16 %v206_v45, %v205_v44  ;;  %v355_v35 = vrot.slane %v350_v33, %v354_v31 }
  0xdd   :  { %v213_v54 = vpack.c.bf16 %v204_v49, %v203_v48  ;;  %400 = vmatprep.subr.bf16.mxu1 %v214_v50 }
  0xde   :  { %401 = vmatpush3.bf16.msra.mxu1 %v214_v50 }
  0xdf   :  { %402 = vmatprep.subr.bf16.mxu1 %v213_v54 }
  0xe2   :  { %403 = vmatpush3.bf16.msra.mxu1 %v213_v54 }
  0xe3   :  { %404 = vmatprep.subr.bf16.mxu1 %v212_v58 }
  0xe6   :  { %405 = vmatpush3.bf16.msra.mxu1 %v212_v58 }
  0xe7   :  { %406 = vmatprep.subr.bf16.mxu1 %v211_v61 }
  0xea   :  { %407 = vmatpush3.bf16.msra.mxu1 %v211_v61 }
  0xed   :  { %409 = vmatmul.mubr.msk.bf16.vlgmr.msra.gmra.mxu1 %vm249_vm1, %v422_v62 }
 0x1ad   :  { %v410_v2 = vpop.f32.mrf.mxu1 }
 0x1ae   :  { %v299_v7 = vadd.f32 %v410_v2, %v232_v1 }
 0x1af   :  { %v290_v4 = vpop.f32.mrf.mxu1 }
 0x1b0   :  { %v291_v5 = vadd.f32 %v290_v4, %v222_v63  ;;  %v307_v14 = vmax.f32 %v299_v7, 0.0 }
 0x1b1   :  { %v411_v6 = vpop.f32.mrf.mxu1 }
 0x1b2   :  { %v305_v10 = vmax.f32 %v291_v5, 0.0  ;;  %v302_v11 = vadd.f32 %v411_v6, %v237_v3  ;;  %v335_v20 = vmul.f32 %v326_v19, %v307_v14 }
 0x1b3   :  { %v293_v9 = vpop.f32.mrf.mxu1 }
 0x1b4   :  { %v294_v12 = vadd.f32 %v293_v9, %v227_v0  ;;  %v333_v16 = vmul.f32 %v316_v8, %v305_v10  ;;  %v308_v17 = vmax.f32 %v302_v11, 0.0 }
 0x1b6   :  { %v306_v15 = vmax.f32 %v294_v12, 0.0  ;;  %v336_v23 = vmul.f32 %v331_v22, %v308_v17 }
 0x1b8   :  { %v334_v18 = vmul.f32 %v321_v13, %v306_v15 }
 0x1ba   :  { %v337_v21 = vadd.f32 %v334_v18, %v333_v16 }
 0x1bc   :  { %v338_v24 = vadd.f32 %v337_v21, %v335_v20 }
 0x1be   :  { %v339_v26 = vadd.f32 %v338_v24, %v336_v23 }
 0x1c0   :  { %v340_v27 = vrot.slane %v339_v26, 4 }
 0x1c2   :  { %v341_v29 = vadd.f32 %v340_v27, %v339_v26 }
 0x1c4   :  { %v342_v30 = vrot.slane %v341_v29, 2 }
 0x1c6   :  { %v343_v32 = vadd.f32 %v342_v30, %v341_v29 }
 0x1c8   :  { %v344_v34 = vrot.slane %v343_v32, 1 }
 0x1ca   :  { %v345_v36 = vadd.f32 %v344_v34, %v343_v32 }
 0x1cc   :  { %v356_v37 = vadd.f32 %v355_v35, %v345_v36 }
 0x1ce   :  { %357 = vst [vmem:[%s555_s7] sm:$0x1] %v356_v37 }

</bundles_post_ra>
